<compile_context>
chip_gen: v7x
topology: tpu7x:2x2x1
jax: 0.10.0
libtpu: 0.0.40
codegen_flags: <defaults>
</compile_context>

<pallas_src>
import jax
import jax.numpy as jnp
from jax.experimental import pallas as pl
from jax.experimental.pallas import tpu as pltpu


_TARGET_BLOCK_BYTES = 4 * 1024 * 1024   # ~4 MiB per block; x2 (in+out) x2 (dbl buf) = 16 MiB VMEM


def _round_up(a, b):
    return -(-a // b) * b


def _sc_kernel(hb_ref, x_ref, o_ref):
    x = x_ref[...]
    hb = hb_ref[0, 0].astype(x.dtype)
    # soft-threshold identity: sign(x) * max(|x| - hb, 0) == x - clip(x, -hb, hb)
    o_ref[...] = x - jnp.minimum(jnp.maximum(x, -hb), hb)


def sc_forward(x, beta, *, donate_input=False):
    """Pallas implementation of SC.forward (soft threshold) for any shape."""
    orig_shape = x.shape
    dtype = x.dtype
    total = x.size
    itemsize = jnp.dtype(dtype).itemsize
    # sublane alignment depends on element width (packed layouts: bf16/int8)
    sublane = {4: 8, 2: 16, 1: 32}.get(itemsize, 8)

    # --- lane-dense 2-D view of the flat tensor, free (no pad) whenever possible ---
    lane = None
    for cand in (1024, 512, 256, 128):
        if total % cand == 0:
            lane = cand
            break

    flat = x.reshape(-1)
    if lane is None:
        # Rare: element count not a multiple of 128 -> minimal pad to next 128.
        # TODO(synk): handle this with a masked 1-D boundary block to drop the pad+slice.
        lane = 128
        padded_total = _round_up(total, lane)
        flat = jnp.pad(flat, (0, padded_total - total))
    else:
        padded_total = total

    rows = padded_total // lane
    x2d = flat.reshape(rows, lane)

    # --- row tile: ~4 MiB blocks in bytes (uniform across dtypes), sublane aligned ---
    rt = (_TARGET_BLOCK_BYTES // itemsize) // lane
    rt = max(sublane, (rt // sublane) * sublane)
    if rows <= rt:
        if rows >= 2 * sublane:
            # Whole tensor fits one block: split in two so both v7x TensorCores
            # get a grid step (harmless on single-core v5e/v6e).
            rt = _round_up(-(-rows // 2), sublane)
        else:
            rt = rows                      # tiny input: one full-array block
    grid = (pl.cdiv(rows, rt),)            # ragged last block handled by masking

    # beta/2 as a (1, 1) f32 SMEM scalar (works for Python floats or traced values).
    half_beta = (jnp.asarray(beta, dtype=jnp.float32) * 0.5).reshape(1, 1)

    extra_kwargs = {}
    if donate_input:
        # Reuse x's HBM buffer for the output (only valid if caller donates x).
        extra_kwargs["input_output_aliases"] = {1: 0}

    out2d = pl.pallas_call(
        _sc_kernel,
        out_shape=jax.ShapeDtypeStruct((rows, lane), dtype),
        grid_spec=pltpu.PrefetchScalarGridSpec(
            num_scalar_prefetch=0,
            grid=grid,
            in_specs=[
                pl.BlockSpec(memory_space=pltpu.MemorySpace.SMEM),
                pl.BlockSpec((rt, lane), lambda i: (i, 0)),
            ],
            out_specs=pl.BlockSpec((rt, lane), lambda i: (i, 0)),
        ),
        compiler_params=pltpu.CompilerParams(
            dimension_semantics=("parallel",),
            vmem_limit_bytes=32 * 1024 * 1024,
        ),
        cost_estimate=pl.CostEstimate(
            flops=3 * padded_total,
            transcendentals=0,
            bytes_accessed=2 * padded_total * itemsize,
        ),
        **extra_kwargs,
    )(half_beta, x2d)

    out_flat = out2d.reshape(-1)
    if padded_total != total:
        out_flat = out_flat[:total]
    return out_flat.reshape(orig_shape)


def _reference(x, beta):
    return jnp.sign(x) * jnp.maximum(jnp.abs(x) - beta / 2, 0.0)


if __name__ == "__main__":
    key = jax.random.PRNGKey(0)
    beta = 0.5

    # 1) Primary case: small NCHW input consistent with the module's usage
    #    (2048 elems -> free (2, 1024) view, no pad, single full block).
    x = jax.random.normal(key, (2, 4, 16, 16), dtype=jnp.float32)
    out = jax.block_until_ready(sc_forward(x, beta))
    assert out.shape == x.shape and out.dtype == x.dtype
    assert jnp.allclose(out, _reference(x, beta), atol=1e-6), "mismatch (aligned case)"

    # 2) Ragged-boundary case: rows (17) not a multiple of the row tile ->
    #    grid of 2 with a masked final block (no padding, no slice).
    k2 = jax.random.PRNGKey(1)
    x2 = jax.random.normal(k2, (1, 17, 32, 32), dtype=jnp.float32)
    out2 = jax.block_until_ready(sc_forward(x2, beta))
    assert jnp.allclose(out2, _reference(x2, beta), atol=1e-6), "mismatch (ragged case)"

    # 3) Unaligned fallback: element count not a multiple of 128 (minimal pad path).
    k3 = jax.random.PRNGKey(2)
    x3 = jax.random.normal(k3, (2, 3, 5, 7), dtype=jnp.float32)
    out3 = jax.block_until_ready(sc_forward(x3, beta))
    assert out3.shape == x3.shape
    assert jnp.allclose(out3, _reference(x3, beta), atol=1e-6), "mismatch (unaligned case)"

    print("KERNEL_OK")
</pallas_src>

<mosaic_0001>
module attributes {stable_mosaic.version = 11 : i64} {
  func.func @_sc_kernel(%arg0: i32, %arg1: memref<1x1xf32, #tpu.memory_space<smem>>, %arg2: memref<2x1024xf32, #tpu.memory_space<vmem>>, %arg3: memref<2x1024xf32, #tpu.memory_space<vmem>>) attributes {dimension_semantics = [#tpu.dimension_semantics<parallel>], iteration_bounds = array<i64: 1>, scalar_prefetch = 0 : i64, scratch_operands = 0 : i64, tpu.core_type = #tpu.core_type<tc>, window_params = [{transform_indices = @transform_0, window_bounds = array<i64: 1, 1>}, {transform_indices = @transform_1, window_bounds = array<i64: 2, 1024>}, {transform_indices = @transform_2, window_bounds = array<i64: 2, 1024>}]} {
    %c0 = arith.constant 0 : index
    %c0_0 = arith.constant 0 : index
    %0 = vector.load %arg2[%c0, %c0_0] : memref<2x1024xf32, #tpu.memory_space<vmem>>, vector<2x1024xf32>
    %c0_1 = arith.constant 0 : index
    %c0_2 = arith.constant 0 : index
    %1 = memref.load %arg1[%c0_1, %c0_2] : memref<1x1xf32, #tpu.memory_space<smem>>
    %cst = arith.constant 0.000000e+00 : f32
    %2 = arith.subf %cst, %1 : f32
    %3 = vector.broadcast %2 : f32 to vector<2x1024xf32>
    %4 = arith.maximumf %0, %3 : vector<2x1024xf32>
    %5 = vector.broadcast %1 : f32 to vector<2x1024xf32>
    %6 = arith.minimumf %4, %5 : vector<2x1024xf32>
    %7 = arith.subf %0, %6 : vector<2x1024xf32>
    %c0_3 = arith.constant 0 : index
    %c0_4 = arith.constant 0 : index
    %8 = vector.load %arg3[%c0_3, %c0_4] : memref<2x1024xf32, #tpu.memory_space<vmem>>, vector<2x1024xf32>
    tpu.vector_store %arg3[%c0_3, %c0_4], %7 {strides = array<i32>} : memref<2x1024xf32, #tpu.memory_space<vmem>>, vector<2x1024xf32>,
    return
  }
  func.func @transform_0(%arg0: i32) -> (i32, i32) {
    %c0_i32 = arith.constant 0 : i32
    %c0_i32_0 = arith.constant 0 : i32
    %c0_i32_1 = arith.constant 0 : i32
    return %c0_i32, %c0_i32_0 : i32, i32
  }
  func.func @transform_1(%arg0: i32) -> (i32, i32) {
    %c0_i32 = arith.constant 0 : i32
    %c0_i32_0 = arith.constant 0 : i32
    return %arg0, %c0_i32 : i32, i32
  }
  func.func @transform_2(%arg0: i32) -> (i32, i32) {
    %c0_i32 = arith.constant 0 : i32
    %c0_i32_0 = arith.constant 0 : i32
    return %arg0, %c0_i32 : i32, i32
  }
}

</mosaic_0001>

<bundles_post_ra>
// kernel: tpu_custom_call.1
= control target key start
LH: loop header
LB: loop body
LE: loop exit
PB: predicated region body
PF: predicated region fallthrough
CT: control target
= control target key end

     0   :  { %8 = vsyncpa [#allocation4], 0  ;;  %s151_s0 = inlined_call_operand.<no memory space> [shape: f32[1,1], index: 0, kind: input, shape index: {}]   ;;  %s152_s1 = inlined_call_operand.hbm [shape: f32[2,1024], index: 1, kind: input, shape index: {}]   ;;  %s153_s2 = inlined_call_operand.hbm [shape: f32[2,1024], index: 2, kind: output, shape index: {}]  }
   0x1   :  { %9 = vsyncpa [#allocation5], 0  ;;  %s104_s9 = smov [#allocation3]   ;;  %s56_s13 = scalar_lea.hbm %s152_s1, 256 }
   0x2   :  { %s18_s10 = sshll.u32 %s104_s9, 4  ;;  %p57_p0 = scmp.ne.s32.totalorder %s152_s1, %s56_s13  ;;  %s19_s10 = int_to_ptr.vmem [resolvable:$true] %s18_s10 }
   0x3   :  { %p60_p1 = scmp.lt.u32.totalorder %s56_s13, %s152_s1 }
   0x5   :  { %p62_p2 = pnand %p60_p1, %p57_p0 }
   0x7   :  { %65 = shalt.err (!%p62_p2)
}
   0x8   :  { %s66_s18 = scalar_lea.vmem %s19_s10, 256  ;;  %p71_p4 = scmp.lt.s32.totalorder %s19_s10, %s19_s10 }
   0x9   :  { %p67_p3 = scmp.ne.s32.totalorder %s19_s10, %s66_s18  ;;  %p72_p5 = scmp.lt.s32.totalorder %s66_s18, %s66_s18 }
   0xb   :  { %p73_p6 = por %p72_p5, %p71_p4 }
   0xd   :  { %p74_p7 = pnand %p73_p6, %p67_p3 }
   0xf   :  { %77 = shalt.err (!%p74_p7)
}
  0x10   :  { %21 = dma.hbm_to_vmem [thread:$0]  %s152_s1, 256, %s19_s10, [#allocation4]  }
  0x11   :  { %100 = dma.done.wait [#allocation4], 256  }
  0x12   :  { %101 = vsyncadd [#allocation4], 4294967040  ;;  %s28_s23 = ssub.f32 0.0, %s151_s0  ;;  %v25_v1 = vld [vmem:[#allocation3] sm:$0xff]  ;;  %v32_v2 = vstv %s151_s0  ;;  %v26_v3 = vld [vmem:[#allocation3 + $0x8] sm:$0xff]  ;;  %s105_s26 = smov [#allocation6]  }
  0x13   :  { %s45_s27 = sshll.u32 %s105_s26, 4  ;;  %s46_s27 = int_to_ptr.vmem [resolvable:$true] %s45_s27 }
  0x14   :  { %v29_v0 = vstv %s28_s23  ;;  %s78_s1 = scalar_lea.vmem %s46_s27, 256  ;;  %p83_p9 = scmp.lt.s32.totalorder %s46_s27, %s46_s27 }
  0x15   :  { %v30_v4 = vmax.f32 %v25_v1, %v29_v0  ;;  %v31_v5 = vmax.f32 %v26_v3, %v29_v0  ;;  %p79_p8 = scmp.ne.s32.totalorder %s46_s27, %s78_s1  ;;  %p84_p10 = scmp.lt.s32.totalorder %s78_s1, %s78_s1 }
  0x17   :  { %v33_v6 = vmin.f32 %v30_v4, %v32_v2  ;;  %v34_v7 = vmin.f32 %v31_v5, %v32_v2  ;;  %p85_p11 = por %p84_p10, %p83_p9 }
  0x19   :  { %v35_v8 = vsub.f32 %v25_v1, %v33_v6  ;;  %v36_v9 = vsub.f32 %v26_v3, %v34_v7  ;;  %p86_p12 = pnand %p85_p11, %p79_p8 }
  0x1b   :  { %37 = vst [vmem:[#allocation6] sm:$0xff] %v35_v8  ;;  %38 = vst [vmem:[#allocation6 + $0x8] sm:$0xff] %v36_v9 }
  0x1c   :  { %89 = shalt.err (!%p86_p12)
}
  0x1d   :  { %s90_s29 = scalar_lea.hbm %s153_s2, 256 }
  0x1e   :  { %p91_p13 = scmp.ne.s32.totalorder %s153_s2, %s90_s29  ;;  %p94_p0 = scmp.lt.u32.totalorder %s90_s29, %s153_s2 }
  0x20   :  { %p96_p1 = pnand %p94_p0, %p91_p13 }
  0x22   :  { %99 = shalt.err (!%p96_p1)
}
  0x23   :  { %48 = dma.vmem_to_hbm [thread:$0]  %s46_s27, 256, %s153_s2, [#allocation5]  }
  0x24   :  { %102 = dma.done.wait [#allocation5], 256  }
  0x25   :  { %103 = vsyncadd [#allocation5], 4294967040 }
  0x26   :  { %52 = vsyncpa [#allocation4], 1 }
  0x27   :  { %53 = vsyncpa [#allocation5], 1 }

</bundles_post_ra>
